<compile_context>
chip_gen: v5e
topology: v5e:2x2
jax: 0.10.0
libtpu: 0.0.40
codegen_flags: <defaults>
</compile_context>

<pallas_src>
import jax
import jax.numpy as jnp
from jax import lax
from jax.experimental import pallas as pl
from jax.experimental.pallas import tpu as pltpu

INPUT_SIZE = 208
LAYER_SIZES = [INPUT_SIZE, 512, 256, 128, 64, 1]
_SUBLANE = 8


def _round_up(n, m):
    return ((n + m - 1) // m) * m


# --------------------------------------------------------------------------
# Kernel
# --------------------------------------------------------------------------
def _dense(h, w_ref, b_ref, *, relu):
    """h @ W + b on the MXU with f32 accumulation; optional ReLU (VPU)."""
    w = w_ref[...]
    if h.dtype != w.dtype:
        h = h.astype(w.dtype)          # bf16 matmul path (weights pre-cast once)
    y = jnp.dot(h, w, preferred_element_type=jnp.float32) + b_ref[...]
    return jnp.maximum(y, 0.0) if relu else y


def _mlp_kernel(x_ref,
                w1_ref, b1_ref,
                w2_ref, b2_ref,
                w3_ref, b3_ref,
                w4_ref, b4_ref,
                w5_ref, b5_ref,
                o_ref):
    """Fused 5-layer MLP forward for one batch tile; all weights VMEM-resident."""
    h = x_ref[...]                                # (tb, 208), f32 or bf16
    h = _dense(h, w1_ref, b1_ref, relu=True)      # (tb, 512)  Dropout(0.3) == id
    h = _dense(h, w2_ref, b2_ref, relu=True)      # (tb, 256)  Dropout(0.2) == id
    h = _dense(h, w3_ref, b3_ref, relu=True)      # (tb, 128)  Dropout(0.2) == id
    h = _dense(h, w4_ref, b4_ref, relu=True)      # (tb, 64)   Dropout(0.1) == id
    # Final Linear(64 -> 1), lane-dense: w5 is stored as an (8, 64) f32 block
    # (row 0 real, rows 1..7 zero), so this is a single (8,64) @ (tb,64)^T MXU
    # pass whose row 0 is the (1, tb) batch-on-lanes result -> unmasked stores.
    out8 = lax.dot_general(w5_ref[...], h,
                           (((1,), (1,)), ((), ())),
                           preferred_element_type=jnp.float32)   # (8, tb)
    o_ref[...] = (out8[0:1, :] + b5_ref[...]).astype(o_ref.dtype)


# --------------------------------------------------------------------------
# Wrapper
# --------------------------------------------------------------------------
def _num_parallel_tensorcores():
    """Best-effort count of TensorCores that dimension_semantics=('parallel',)
    can shard a grid across (v7x / megacore chips -> 2; v5e/v6e -> 1)."""
    try:
        info = pltpu.get_tpu_info()
        for attr in ("tensorcores_per_chip", "num_tensorcores",
                     "cores_per_chip", "num_cores"):
            n = getattr(info, attr, None)
            if isinstance(n, int) and n >= 1:
                return n
    except Exception:
        pass
    try:
        kind = (getattr(jax.devices()[0], "device_kind", "") or "").lower()
        if any(tag in kind for tag in ("v7", "v4", "v5p")):
            return 2
    except Exception:
        pass
    return 1


def _choose_tiling(B, tile_b, cores):
    """Pick (tile_rows, grid_steps). No divisibility requirement on B."""
    tb = max(_SUBLANE, min(int(tile_b), _round_up(B, _SUBLANE)))
    tb = _round_up(tb, _SUBLANE)
    steps = pl.cdiv(B, tb)
    if cores >= 2:
        # v7x-style 2-TC chips: keep both cores busy.
        if steps == 1 and tb > _SUBLANE:
            tb = _round_up((tb + 1) // 2, _SUBLANE)
        elif steps > 1 and steps % 2 == 1:
            tb = _round_up(pl.cdiv(B, steps + 1), _SUBLANE)
        steps = pl.cdiv(B, tb)
    return tb, steps


def prepare_params(params, matmul_dtype=jnp.bfloat16):
    """One-time parameter prep (hoisted out of the per-call forward).

    params: [(w1,b1),...,(w5,b5)] with weights stored (in_features, out_features)
    (transpose of the torch layout) and biases (1, out_features).

      * the four big matmul weights are cast to `matmul_dtype` (bf16 by default,
        MXU-native on v5e/v6e/v7x; pass None to keep exact f32 matmuls),
      * w5 (64,1) is reshaped + zero-padded to an (8,64) f32 row block so the
        final layer runs as one lane-dense MXU pass,
      * biases stay f32 (bias add / ReLU / accumulation are always f32).
    """
    (w1, b1), (w2, b2), (w3, b3), (w4, b4), (w5, b5) = params
    if matmul_dtype is None:
        cast = lambda w: w.astype(jnp.float32)
    else:
        cast = lambda w: w.astype(matmul_dtype)
    w5p = jnp.pad(w5.reshape(1, LAYER_SIZES[-2]).astype(jnp.float32),
                  ((0, _SUBLANE - 1), (0, 0)))                     # (8, 64)
    return (cast(w1), b1.astype(jnp.float32),
            cast(w2), b2.astype(jnp.float32),
            cast(w3), b3.astype(jnp.float32),
            cast(w4), b4.astype(jnp.float32),
            w5p, b5.reshape(1, 1).astype(jnp.float32))


def property_net_forward(x, prepared, *, tile_b=None):
    """PropertyNet forward.  x: (B, 208) float32 or bfloat16 -> (B, 1) float32.

    prepared: output of prepare_params() (one-time weight prep).
    tile_b:   batch tile; default 2048 for bf16 weights / 1024 for f32 weights
              (multiples of 8; shrunk automatically for small batches).
    Passing x already in bf16 halves the dominant input DMA stream; f32 x is
    cast to the matmul dtype inside the kernel (no extra HBM pass either way).
    """
    B, D = x.shape
    assert D == INPUT_SIZE, f"expected {INPUT_SIZE} input features, got {D}"

    w1, b1, w2, b2, w3, b3, w4, b4, w5p, b5 = prepared
    flat = [w1, b1, w2, b2, w3, b3, w4, b4, w5p, b5]

    if tile_b is None:
        tile_b = 2048 if w1.dtype == jnp.bfloat16 else 1024

    cores = _num_parallel_tensorcores()
    tb, steps = _choose_tiling(B, tile_b, cores)
    grid = (steps,)

    # Weights/biases: whole tensor VMEM-resident every grid step, single
    # buffered (the block never changes, so no per-step DMA and no second copy).
    def resident_spec(a):
        zeros = (0,) * a.ndim
        idx = lambda i, _z=zeros: _z
        try:
            return pl.BlockSpec(a.shape, idx, pipeline_mode=pl.Buffered(1))
        except TypeError:  # older BlockSpec signature without pipeline_mode
            return pl.BlockSpec(a.shape, idx)

    # x: unpadded (tb, 208) block; last dim == full array dim is legal and the
    # K=208 dot lets Mosaic pad internally. Ragged last tiles rely on Pallas
    # boundary handling: garbage rows are row-local and sliced off below.
    # (If the x DMA ever becomes exposed after the bf16 changes, bump this spec
    # to pipeline_mode=pl.Buffered(3).)
    in_specs = [pl.BlockSpec((tb, INPUT_SIZE), lambda i: (i, 0))]
    in_specs += [resident_spec(a) for a in flat]
    # Lane-dense output: batch on the lane axis, one (1, tb) row per grid step.
    out_spec = pl.BlockSpec((1, tb), lambda i: (i, 0))

    macs_per_row = sum(LAYER_SIZES[i] * LAYER_SIZES[i + 1]
                       for i in range(len(LAYER_SIZES) - 1))
    param_bytes = sum(int(a.size) * a.dtype.itemsize for a in flat)
    cost = pl.CostEstimate(
        flops=2 * B * macs_per_row,
        transcendentals=0,
        bytes_accessed=int(B * INPUT_SIZE * x.dtype.itemsize
                           + steps * tb * 4 + param_bytes),
    )

    out = pl.pallas_call(
        _mlp_kernel,
        out_shape=jax.ShapeDtypeStruct((steps, tb), jnp.float32),
        grid_spec=pltpu.PrefetchScalarGridSpec(
            num_scalar_prefetch=0,
            grid=grid,
            in_specs=in_specs,
            out_specs=out_spec,
        ),
        compiler_params=pltpu.CompilerParams(
            dimension_semantics=("parallel",),
            # Peak usage at tb=2048 is ~12-16 MiB; 32 MiB is safe on every
            # generation (v5e default scope is 16 MiB, v7x physical is 64 MiB).
            vmem_limit_bytes=32 * 1024 * 1024,
        ),
        cost_estimate=cost,
    )(x, *flat)

    return out.reshape(-1, 1)[:B]


# --------------------------------------------------------------------------
# Init / reference (for the self-test)
# --------------------------------------------------------------------------
def init_params(key):
    """Xavier-uniform weights (matches torch.nn.init.xavier_uniform_), zero biases.

    Weights stored as (in_features, out_features) -- transpose of the torch
    layout -- so each layer is h @ W + b.  Biases are (1, out_features); callers
    converting real PyTorch checkpoints must transpose W and reshape b."""
    params = []
    for i in range(len(LAYER_SIZES) - 1):
        fan_in, fan_out = LAYER_SIZES[i], LAYER_SIZES[i + 1]
        key, wkey = jax.random.split(key)
        limit = (6.0 / (fan_in + fan_out)) ** 0.5
        w = jax.random.uniform(wkey, (fan_in, fan_out), jnp.float32,
                               minval=-limit, maxval=limit)
        b = jnp.zeros((1, fan_out), jnp.float32)
        params.append((w, b))
    return params


def reference_forward(x, params):
    """Plain-JAX reference for correctness checking (eval-mode dropout = id)."""
    h = x
    for li, (w, b) in enumerate(params):
        h = h @ w + b
        if li < len(params) - 1:
            h = jnp.maximum(h, 0.0)
    return h


if __name__ == "__main__":
    key = jax.random.PRNGKey(0)
    pkey, xkey = jax.random.split(key)

    params = init_params(pkey)
    B = 13  # small, deliberately ragged batch: exercises boundary tiles
    x = jax.random.normal(xkey, (B, INPUT_SIZE), jnp.float32)

    ref = reference_forward(x, params)

    # Exact f32 matmul path.
    prep_f32 = prepare_params(params, matmul_dtype=None)
    out_f32 = jax.block_until_ready(property_net_forward(x, prep_f32))
    assert out_f32.shape == (B, 1)
    assert jnp.allclose(out_f32, ref, atol=1e-4, rtol=1e-4), "f32 mismatch"

    # Explicit small tile: multi-step grid with the same index maps.
    out_small = jax.block_until_ready(property_net_forward(x, prep_f32, tile_b=8))
    assert jnp.allclose(out_small, ref, atol=1e-4, rtol=1e-4), "tiled mismatch"

    # Default fast path: bf16 matmuls with f32 accumulation.
    prep_bf16 = prepare_params(params)
    out_bf16 = jax.block_until_ready(property_net_forward(x, prep_bf16))
    tol = 0.05 * (1.0 + float(jnp.max(jnp.abs(ref))))
    assert float(jnp.max(jnp.abs(out_bf16 - ref))) < tol, "bf16 path diverged"

    # bf16 activations too (halves the input DMA when the producer emits bf16).
    out_bf16x = jax.block_until_ready(
        property_net_forward(x.astype(jnp.bfloat16), prep_bf16))
    assert float(jnp.max(jnp.abs(out_bf16x - ref))) < tol, "bf16-x path diverged"

    print("KERNEL_OK")
</pallas_src>

<mosaic_0001>
module attributes {stable_mosaic.version = 11 : i64} {
  func.func @_mlp_kernel(%arg0: i32, %arg1: memref<16x208xf32, #tpu.memory_space<vmem>>, %arg2: memref<208x512xf32, #tpu.memory_space<vmem>>, %arg3: memref<1x512xf32, #tpu.memory_space<vmem>>, %arg4: memref<512x256xf32, #tpu.memory_space<vmem>>, %arg5: memref<1x256xf32, #tpu.memory_space<vmem>>, %arg6: memref<256x128xf32, #tpu.memory_space<vmem>>, %arg7: memref<1x128xf32, #tpu.memory_space<vmem>>, %arg8: memref<128x64xf32, #tpu.memory_space<vmem>>, %arg9: memref<1x64xf32, #tpu.memory_space<vmem>>, %arg10: memref<8x64xf32, #tpu.memory_space<vmem>>, %arg11: memref<1x1xf32, #tpu.memory_space<vmem>>, %arg12: memref<1x16xf32, #tpu.memory_space<vmem>>) attributes {dimension_semantics = [#tpu.dimension_semantics<parallel>], iteration_bounds = array<i64: 1>, scalar_prefetch = 0 : i64, scratch_operands = 0 : i64, tpu.core_type = #tpu.core_type<tc>, window_params = [{transform_indices = @transform_0, window_bounds = array<i64: 16, 208>}, {pipeline_mode = #tpu.pipeline_mode<synchronous>, transform_indices = @transform_1, window_bounds = array<i64: 208, 512>}, {pipeline_mode = #tpu.pipeline_mode<synchronous>, transform_indices = @transform_2, window_bounds = array<i64: 1, 512>}, {pipeline_mode = #tpu.pipeline_mode<synchronous>, transform_indices = @transform_3, window_bounds = array<i64: 512, 256>}, {pipeline_mode = #tpu.pipeline_mode<synchronous>, transform_indices = @transform_4, window_bounds = array<i64: 1, 256>}, {pipeline_mode = #tpu.pipeline_mode<synchronous>, transform_indices = @transform_5, window_bounds = array<i64: 256, 128>}, {pipeline_mode = #tpu.pipeline_mode<synchronous>, transform_indices = @transform_6, window_bounds = array<i64: 1, 128>}, {pipeline_mode = #tpu.pipeline_mode<synchronous>, transform_indices = @transform_7, window_bounds = array<i64: 128, 64>}, {pipeline_mode = #tpu.pipeline_mode<synchronous>, transform_indices = @transform_8, window_bounds = array<i64: 1, 64>}, {pipeline_mode = #tpu.pipeline_mode<synchronous>, transform_indices = @transform_9, window_bounds = array<i64: 8, 64>}, {pipeline_mode = #tpu.pipeline_mode<synchronous>, transform_indices = @transform_10, window_bounds = array<i64: 1, 1>}, {transform_indices = @transform_11, window_bounds = array<i64: 1, 16>}]} {
    %c0 = arith.constant 0 : index
    %c0_0 = arith.constant 0 : index
    %0 = vector.load %arg1[%c0, %c0_0] : memref<16x208xf32, #tpu.memory_space<vmem>>, vector<16x208xf32>
    %c0_1 = arith.constant 0 : index
    %c0_2 = arith.constant 0 : index
    %1 = vector.load %arg2[%c0_1, %c0_2] : memref<208x512xf32, #tpu.memory_space<vmem>>, vector<208x512xf32>
    %cst = arith.constant dense<0.000000e+00> : vector<16x512xf32>
    %2 = tpu.matmul %0, %1, %cst {dimension_numbers = #tpu.dot_dimension_numbers<[1], [0], [0], [1], [0, 0, 1, 1], [], []>} : vector<16x208xf32>, vector<208x512xf32>, vector<16x512xf32> -> vector<16x512xf32>
    %c0_3 = arith.constant 0 : index
    %c0_4 = arith.constant 0 : index
    %3 = vector.load %arg3[%c0_3, %c0_4] : memref<1x512xf32, #tpu.memory_space<vmem>>, vector<1x512xf32>
    %4 = vector.broadcast %3 : vector<1x512xf32> to vector<16x512xf32>
    %5 = arith.addf %2, %4 : vector<16x512xf32>
    %cst_5 = arith.constant 0.000000e+00 : f32
    %6 = vector.broadcast %cst_5 : f32 to vector<16x512xf32>
    %7 = arith.maximumf %5, %6 : vector<16x512xf32>
    %c0_6 = arith.constant 0 : index
    %c0_7 = arith.constant 0 : index
    %8 = vector.load %arg4[%c0_6, %c0_7] : memref<512x256xf32, #tpu.memory_space<vmem>>, vector<512x256xf32>
    %cst_8 = arith.constant dense<0.000000e+00> : vector<16x256xf32>
    %9 = tpu.matmul %7, %8, %cst_8 {dimension_numbers = #tpu.dot_dimension_numbers<[1], [0], [0], [1], [0, 0, 1, 1], [], []>} : vector<16x512xf32>, vector<512x256xf32>, vector<16x256xf32> -> vector<16x256xf32>
    %c0_9 = arith.constant 0 : index
    %c0_10 = arith.constant 0 : index
    %10 = vector.load %arg5[%c0_9, %c0_10] : memref<1x256xf32, #tpu.memory_space<vmem>>, vector<1x256xf32>
    %11 = vector.broadcast %10 : vector<1x256xf32> to vector<16x256xf32>
    %12 = arith.addf %9, %11 : vector<16x256xf32>
    %cst_11 = arith.constant 0.000000e+00 : f32
    %13 = vector.broadcast %cst_11 : f32 to vector<16x256xf32>
    %14 = arith.maximumf %12, %13 : vector<16x256xf32>
    %c0_12 = arith.constant 0 : index
    %c0_13 = arith.constant 0 : index
    %15 = vector.load %arg6[%c0_12, %c0_13] : memref<256x128xf32, #tpu.memory_space<vmem>>, vector<256x128xf32>
    %cst_14 = arith.constant dense<0.000000e+00> : vector<16x128xf32>
    %16 = tpu.matmul %14, %15, %cst_14 {dimension_numbers = #tpu.dot_dimension_numbers<[1], [0], [0], [1], [0, 0, 1, 1], [], []>} : vector<16x256xf32>, vector<256x128xf32>, vector<16x128xf32> -> vector<16x128xf32>
    %c0_15 = arith.constant 0 : index
    %c0_16 = arith.constant 0 : index
    %17 = vector.load %arg7[%c0_15, %c0_16] : memref<1x128xf32, #tpu.memory_space<vmem>>, vector<1x128xf32>
    %18 = vector.broadcast %17 : vector<1x128xf32> to vector<16x128xf32>
    %19 = arith.addf %16, %18 : vector<16x128xf32>
    %cst_17 = arith.constant 0.000000e+00 : f32
    %20 = vector.broadcast %cst_17 : f32 to vector<16x128xf32>
    %21 = arith.maximumf %19, %20 : vector<16x128xf32>
    %c0_18 = arith.constant 0 : index
    %c0_19 = arith.constant 0 : index
    %22 = vector.load %arg8[%c0_18, %c0_19] : memref<128x64xf32, #tpu.memory_space<vmem>>, vector<128x64xf32>
    %cst_20 = arith.constant dense<0.000000e+00> : vector<16x64xf32>
    %23 = tpu.matmul %21, %22, %cst_20 {dimension_numbers = #tpu.dot_dimension_numbers<[1], [0], [0], [1], [0, 0, 1, 1], [], []>} : vector<16x128xf32>, vector<128x64xf32>, vector<16x64xf32> -> vector<16x64xf32>
    %c0_21 = arith.constant 0 : index
    %c0_22 = arith.constant 0 : index
    %24 = vector.load %arg9[%c0_21, %c0_22] : memref<1x64xf32, #tpu.memory_space<vmem>>, vector<1x64xf32>
    %25 = vector.broadcast %24 : vector<1x64xf32> to vector<16x64xf32>
    %26 = arith.addf %23, %25 : vector<16x64xf32>
    %cst_23 = arith.constant 0.000000e+00 : f32
    %27 = vector.broadcast %cst_23 : f32 to vector<16x64xf32>
    %28 = arith.maximumf %26, %27 : vector<16x64xf32>
    %c0_24 = arith.constant 0 : index
    %c0_25 = arith.constant 0 : index
    %29 = vector.load %arg10[%c0_24, %c0_25] : memref<8x64xf32, #tpu.memory_space<vmem>>, vector<8x64xf32>
    %cst_26 = arith.constant dense<0.000000e+00> : vector<8x16xf32>
    %30 = tpu.matmul %29, %28, %cst_26 {dimension_numbers = #tpu.dot_dimension_numbers<[1], [1], [0], [0], [0, 0, 1, 0], [], []>} : vector<8x64xf32>, vector<16x64xf32>, vector<8x16xf32> -> vector<8x16xf32>
    %31 = vector.extract_strided_slice %30 {offsets = [0, 0], sizes = [1, 16], strides = [1, 1]} : vector<8x16xf32> to vector<1x16xf32>
    %c0_27 = arith.constant 0 : index
    %c0_28 = arith.constant 0 : index
    %32 = vector.load %arg11[%c0_27, %c0_28] : memref<1x1xf32, #tpu.memory_space<vmem>>, vector<1x1xf32>
    %33 = vector.broadcast %32 : vector<1x1xf32> to vector<1x16xf32>
    %34 = arith.addf %31, %33 : vector<1x16xf32>
    %c0_29 = arith.constant 0 : index
    %c0_30 = arith.constant 0 : index
    %35 = vector.load %arg12[%c0_29, %c0_30] : memref<1x16xf32, #tpu.memory_space<vmem>>, vector<1x16xf32>
    tpu.vector_store %arg12[%c0_29, %c0_30], %34 {strides = array<i32>} : memref<1x16xf32, #tpu.memory_space<vmem>>, vector<1x16xf32>,
    return
  }
  func.func @transform_0(%arg0: i32) -> (i32, i32) {
    %c0_i32 = arith.constant 0 : i32
    %c0_i32_0 = arith.constant 0 : i32
    return %arg0, %c0_i32 : i32, i32
  }
  func.func @transform_1(%arg0: i32) -> (i32, i32) {
    %c0_i32 = arith.constant 0 : i32
    %c0_i32_0 = arith.constant 0 : i32
    %c0_i32_1 = arith.constant 0 : i32
    return %c0_i32, %c0_i32_0 : i32, i32
  }
  func.func @transform_2(%arg0: i32) -> (i32, i32) {
    %c0_i32 = arith.constant 0 : i32
    %c0_i32_0 = arith.constant 0 : i32
    %c0_i32_1 = arith.constant 0 : i32
    return %c0_i32, %c0_i32_0 : i32, i32
  }
  func.func @transform_3(%arg0: i32) -> (i32, i32) {
    %c0_i32 = arith.constant 0 : i32
    %c0_i32_0 = arith.constant 0 : i32
    %c0_i32_1 = arith.constant 0 : i32
    return %c0_i32, %c0_i32_0 : i32, i32
  }
  func.func @transform_4(%arg0: i32) -> (i32, i32) {
    %c0_i32 = arith.constant 0 : i32
    %c0_i32_0 = arith.constant 0 : i32
    %c0_i32_1 = arith.constant 0 : i32
    return %c0_i32, %c0_i32_0 : i32, i32
  }
  func.func @transform_5(%arg0: i32) -> (i32, i32) {
    %c0_i32 = arith.constant 0 : i32
    %c0_i32_0 = arith.constant 0 : i32
    %c0_i32_1 = arith.constant 0 : i32
    return %c0_i32, %c0_i32_0 : i32, i32
  }
  func.func @transform_6(%arg0: i32) -> (i32, i32) {
    %c0_i32 = arith.constant 0 : i32
    %c0_i32_0 = arith.constant 0 : i32
    %c0_i32_1 = arith.constant 0 : i32
    return %c0_i32, %c0_i32_0 : i32, i32
  }
  func.func @transform_7(%arg0: i32) -> (i32, i32) {
    %c0_i32 = arith.constant 0 : i32
    %c0_i32_0 = arith.constant 0 : i32
    %c0_i32_1 = arith.constant 0 : i32
    return %c0_i32, %c0_i32_0 : i32, i32
  }
  func.func @transform_8(%arg0: i32) -> (i32, i32) {
    %c0_i32 = arith.constant 0 : i32
    %c0_i32_0 = arith.constant 0 : i32
    %c0_i32_1 = arith.constant 0 : i32
    return %c0_i32, %c0_i32_0 : i32, i32
  }
  func.func @transform_9(%arg0: i32) -> (i32, i32) {
    %c0_i32 = arith.constant 0 : i32
    %c0_i32_0 = arith.constant 0 : i32
    %c0_i32_1 = arith.constant 0 : i32
    return %c0_i32, %c0_i32_0 : i32, i32
  }
  func.func @transform_10(%arg0: i32) -> (i32, i32) {
    %c0_i32 = arith.constant 0 : i32
    %c0_i32_0 = arith.constant 0 : i32
    %c0_i32_1 = arith.constant 0 : i32
    return %c0_i32, %c0_i32_0 : i32, i32
  }
  func.func @transform_11(%arg0: i32) -> (i32, i32) {
    %c0_i32 = arith.constant 0 : i32
    %c0_i32_0 = arith.constant 0 : i32
    return %arg0, %c0_i32 : i32, i32
  }
}

</mosaic_0001>

<bundles_post_ra>
// kernel: tpu_custom_call.1
= control target key start
LH: loop header
LB: loop body
LE: loop exit
PB: predicated region body
PF: predicated region fallthrough
CT: control target
= control target key end

     0   :  { %s1241_s0 = inlined_call_operand.vmem [shape: f32[13,208], index: 0, kind: input, shape index: {}]   ;;  %s1242_s1 = inlined_call_operand.hbm [shape: f32[208,512], index: 1, kind: input, shape index: {}]   ;;  %s1243_s2 = inlined_call_operand.vmem [shape: f32[1,512], index: 2, kind: input, shape index: {}]   ;;  %s1244_s3 = inlined_call_operand.hbm [shape: f32[512,256], index: 3, kind: input, shape index: {}]   ;;  %s1245_s4 = inlined_call_operand.vmem [shape: f32[1,256], index: 4, kind: input, shape index: {}]   ;;  %s1246_s5 = inlined_call_operand.hbm [shape: f32[256,128], index: 5, kind: input, shape index: {}]   ;;  %s1247_s6 = inlined_call_operand.vmem [shape: f32[1,128], index: 6, kind: input, shape index: {}]   ;;  %s1248_s7 = inlined_call_operand.vmem [shape: f32[128,64], index: 7, kind: input, shape index: {}]   ;;  %s1249_s8 = inlined_call_operand.vmem [shape: f32[1,64], index: 8, kind: input, shape index: {}]   ;;  %s1250_s9 = inlined_call_operand.vmem [shape: f32[8,64], index: 9, kind: input, shape index: {}]   ;;  %s1251_s10 = inlined_call_operand.<no memory space> [shape: f32[1,1], index: 10, kind: input, shape index: {}]   ;;  %s1252_s11 = inlined_call_operand.hbm [shape: f32[1,16], index: 11, kind: output, shape index: {}]  }
   0x1   :  { %v16_v0 = vstv %s1251_s10 }
   0x2   :  { %17 = vst [vmem:[#allocation2] sm:$0x1] %v16_v0 }
   0x3   :  { %18 = vsyncpa [#allocation4], 0 }
   0x4   :  { %19 = vsyncpa [#allocation7], 0  ;;  %s42_s21 = sshll.u32 %s1244_s3, 4  ;;  %s43_s21 = int_to_ptr.hbm [resolvable:$true] %s42_s21 }
   0x5   :  { %20 = vsyncpa [#allocation5], 0  ;;  %s1042_s22 = smov [#allocation6]   ;;  %s27_s26 = sshll.u32 %s1242_s1, 4  ;;  %s28_s26 = int_to_ptr.hbm [resolvable:$true] %s27_s26 }
   0x6   :  { %s44_s23 = sshll.u32 %s1042_s22, 4  ;;  %s1043_s27 = smov 256   ;;  %s45_s23 = int_to_ptr.vmem [resolvable:$true] %s44_s23 }
   0x7   :  { %s1044_s28 = smov 16   ;;  %s1045_s10 = smov [#allocation3]  }
   0x8   :  { %50 = dma.hbm_to_vmem [thread:$0]  %s43_s21, 16384, %s45_s23, [#allocation7], %s1043_s27, %s1043_s27, %s1044_s28  }
   0x9   :  { %s29_s29 = sshll.u32 %s1045_s10, 4  ;;  %s1046_s30 = smov 512   ;;  %s30_s29 = int_to_ptr.vmem [resolvable:$true] %s29_s29 }
   0xa   :  { %s1047_s12 = smov 32   ;;  %s57_s14 = sshll.u32 %s1246_s5, 4  ;;  %s58_s14 = int_to_ptr.hbm [resolvable:$true] %s57_s14 }
   0xb   :  { %35 = dma.hbm_to_vmem [thread:$0]  %s28_s26, 13312, %s30_s29, [#allocation4], %s1046_s30, %s1046_s30, %s1047_s12  }
   0xc   :  { %s1048_s15 = smov [#allocation8]   ;;  %s1049_s17 = smov 128  }
   0xd   :  { %s59_s16 = sshll.u32 %s1048_s15, 4  ;;  %s1050_s1 = smov 8   ;;  %s60_s16 = int_to_ptr.vmem [resolvable:$true] %s59_s16 }
   0xe   :  { %65 = dma.hbm_to_vmem [thread:$0]  %s58_s14, 4096, %s60_s16, [#allocation7], %s1049_s17, %s1049_s17, %s1050_s1  }
   0xf   :  { %1036 = dma.done.wait [#allocation4], 13312  }
  0x10   :  { %1037 = vsyncadd [#allocation4], 4294953984 }
  0x11   :  { %1038 = dma.done.wait [#allocation7], 20480  }
  0x12   :  { %1039 = vsyncadd [#allocation7], 4294946816  ;;  %v152_v1 = vld [vmem:[#allocation3 + $0x1e0] sm:$0xff]  ;;  %v153_v3 = vld [vmem:[#allocation3 + $0x1e8] sm:$0xff]  ;;  %vm206_vm0 = vcmask 654336   ;;  %vm857_vm1 = vcmask 523264  }
  0x13   :  { %v192_v2 = vld [vmem:[#allocation3 + $0x320] sm:$0xff]  ;;  %213 = vmatpush.msra.mxu0 %v152_v1  ;;  %v149_v6 = vld [vmem:[#allocation3 + $0x1c8] sm:$0xff]  ;;  %259 = vmatpush.msra.mxu2 %v153_v3  ;;  %v154_v38 = vld [vmem:[#allocation3 + $0x1f0] sm:$0xff]  ;;  %s1052_s15 = smov [#allocation9]   ;;  %vm895_vm2 = vcmask 122880  }
  0x14   :  { %242 = vmatpush.msra.mxu1 %v192_v2  ;;  %v148_v4 = vld [vmem:[#allocation3 + $0x1c0] sm:$0xff]  ;;  %v145_v9 = vld [vmem:[#allocation3 + $0x1a8] sm:$0xff]  ;;  %v150_v42 = vld [vmem:[#allocation3 + $0x1d0] sm:$0xff]  ;;  %s902_s16 = sshll.u32 %s1052_s15, 4  ;;  %s903_s16 = int_to_ptr.vmem [resolvable:$true] %s902_s16 }
  0x15   :  { %v188_v5 = vld [vmem:[#allocation3 + $0x300] sm:$0xff]  ;;  %214 = vmatpush.msra.mxu0 %v148_v4  ;;  %260 = vmatpush.msra.mxu2 %v149_v6  ;;  %v141_v12 = vld [vmem:[#allocation3 + $0x188] sm:$0xff]  ;;  %v146_v46 = vld [vmem:[#allocation3 + $0x1b0] sm:$0xff] }
  0x16   :  { %v144_v7 = vld [vmem:[#allocation3 + $0x1a0] sm:$0xff]  ;;  %243 = vmatpush.msra.mxu1 %v188_v5  ;;  %v193_v13 = vld [vmem:[#allocation3 + $0x328] sm:$0xff]  ;;  %v142_v50 = vld [vmem:[#allocation3 + $0x190] sm:$0xff] }
  0x17   :  { %v184_v8 = vld [vmem:[#allocation3 + $0x2e0] sm:$0xff]  ;;  %215 = vmatpush.msra.mxu0 %v144_v7  ;;  %261 = vmatpush.msra.mxu2 %v145_v9  ;;  %v189_v16 = vld [vmem:[#allocation3 + $0x308] sm:$0xff]  ;;  %v194_v52 = vld [vmem:[#allocation3 + $0x330] sm:$0xff] }
  0x18   :  { %v140_v10 = vld [vmem:[#allocation3 + $0x180] sm:$0xff]  ;;  %244 = vmatpush.msra.mxu1 %v184_v8  ;;  %288 = vmatpush.msra.mxu3 %v193_v13  ;;  %v137_v17 = vld [vmem:[#allocation3 + $0x168] sm:$0xff]  ;;  %v138_v54 = vld [vmem:[#allocation3 + $0x170] sm:$0xff] }
  0x19   :  { %v180_v11 = vld [vmem:[#allocation3 + $0x2c0] sm:$0xff]  ;;  %216 = vmatpush.msra.mxu0 %v140_v10  ;;  %v185_v18 = vld [vmem:[#allocation3 + $0x2e8] sm:$0xff]  ;;  %262 = vmatpush.msra.mxu2 %v141_v12  ;;  %v190_v56 = vld [vmem:[#allocation3 + $0x310] sm:$0xff] }
  0x1a   :  { %v136_v14 = vld [vmem:[#allocation3 + $0x160] sm:$0xff]  ;;  %245 = vmatpush.msra.mxu1 %v180_v11  ;;  %289 = vmatpush.msra.mxu3 %v189_v16  ;;  %v133_v21 = vld [vmem:[#allocation3 + $0x148] sm:$0xff]  ;;  %v134_v58 = vld [vmem:[#allocation3 + $0x150] sm:$0xff] }
  0x1b   :  { %v176_v15 = vld [vmem:[#allocation3 + $0x2a0] sm:$0xff]  ;;  %217 = vmatpush.msra.mxu0 %v136_v14  ;;  %v181_v22 = vld [vmem:[#allocation3 + $0x2c8] sm:$0xff]  ;;  %263 = vmatpush.msra.mxu2 %v137_v17  ;;  %v130_v63 = vld [vmem:[#allocation3 + $0x130] sm:$0xff] }
  0x1c   :  { %v132_v19 = vld [vmem:[#allocation3 + $0x140] sm:$0xff]  ;;  %246 = vmatpush.msra.mxu1 %v176_v15  ;;  %290 = vmatpush.msra.mxu3 %v185_v18  ;;  %v129_v25 = vld [vmem:[#allocation3 + $0x128] sm:$0xff]  ;;  %v186_v0 = vld [vmem:[#allocation3 + $0x2f0] sm:$0xff] }
  0x1d   :  { %v172_v20 = vld [vmem:[#allocation3 + $0x280] sm:$0xff]  ;;  %218 = vmatpush.msra.mxu0 %v132_v19  ;;  %v177_v26 = vld [vmem:[#allocation3 + $0x2a8] sm:$0xff]  ;;  %264 = vmatpush.msra.mxu2 %v133_v21  ;;  %v155_v1 = vld [vmem:[#allocation3 + $0x1f8] sm:$0xff] }
  0x1e   :  { %v128_v23 = vld [vmem:[#allocation3 + $0x120] sm:$0xff]  ;;  %247 = vmatpush.msra.mxu1 %v172_v20  ;;  %291 = vmatpush.msra.mxu3 %v181_v22  ;;  %v125_v29 = vld [vmem:[#allocation3 + $0x108] sm:$0xff]  ;;  %v195_v2 = vld [vmem:[#allocation3 + $0x338] sm:$0xff] }
  0x1f   :  { %v168_v24 = vld [vmem:[#allocation3 + $0x260] sm:$0xff]  ;;  %219 = vmatpush.msra.mxu0 %v128_v23  ;;  %v173_v30 = vld [vmem:[#allocation3 + $0x288] sm:$0xff]  ;;  %265 = vmatpush.msra.mxu2 %v129_v25  ;;  %v126_v3 = vld [vmem:[#allocation3 + $0x110] sm:$0xff] }
  0x20   :  { %v124_v27 = vld [vmem:[#allocation3 + $0x100] sm:$0xff]  ;;  %248 = vmatpush.msra.mxu1 %v168_v24  ;;  %292 = vmatpush.msra.mxu3 %v177_v26  ;;  %v121_v33 = vld [vmem:[#allocation3 + $0xe8] sm:$0xff]  ;;  %v182_v4 = vld [vmem:[#allocation3 + $0x2d0] sm:$0xff] }
  0x21   :  { %v164_v28 = vld [vmem:[#allocation3 + $0x240] sm:$0xff]  ;;  %220 = vmatpush.msra.mxu0 %v124_v27  ;;  %v169_v34 = vld [vmem:[#allocation3 + $0x268] sm:$0xff]  ;;  %266 = vmatpush.msra.mxu2 %v125_v29  ;;  %v151_v5 = vld [vmem:[#allocation3 + $0x1d8] sm:$0xff] }
  0x22   :  { %v120_v31 = vld [vmem:[#allocation3 + $0xe0] sm:$0xff]  ;;  %249 = vmatpush.msra.mxu1 %v164_v28  ;;  %293 = vmatpush.msra.mxu3 %v173_v30  ;;  %v117_v37 = vld [vmem:[#allocation3 + $0xc8] sm:$0xff]  ;;  %v191_v6 = vld [vmem:[#allocation3 + $0x318] sm:$0xff] }
  0x23   :  { %v160_v32 = vld [vmem:[#allocation3 + $0x220] sm:$0xff]  ;;  %221 = vmatpush.msra.mxu0 %v120_v31  ;;  %267 = vmatpush.msra.mxu2 %v121_v33  ;;  %v165_v40 = vld [vmem:[#allocation3 + $0x248] sm:$0xff]  ;;  %v122_v7 = vld [vmem:[#allocation3 + $0xf0] sm:$0xff] }
  0x24   :  { %v116_v35 = vld [vmem:[#allocation3 + $0xc0] sm:$0xff]  ;;  %250 = vmatpush.msra.mxu1 %v160_v32  ;;  %294 = vmatpush.msra.mxu3 %v169_v34  ;;  %v113_v41 = vld [vmem:[#allocation3 + $0xa8] sm:$0xff]  ;;  %v178_v8 = vld [vmem:[#allocation3 + $0x2b0] sm:$0xff] }
  0x25   :  { %v156_v36 = vld [vmem:[#allocation3 + $0x200] sm:$0xff]  ;;  %222 = vmatpush.msra.mxu0 %v116_v35  ;;  %268 = vmatpush.msra.mxu2 %v117_v37  ;;  %v161_v44 = vld [vmem:[#allocation3 + $0x228] sm:$0xff]  ;;  %v147_v9 = vld [vmem:[#allocation3 + $0x1b8] sm:$0xff] }
  0x26   :  { %v112_v39 = vld [vmem:[#allocation3 + $0xa0] sm:$0xff]  ;;  %251 = vmatpush.msra.mxu1 %v156_v36  ;;  %v109_v45 = vld [vmem:[#allocation3 + $0x88] sm:$0xff]  ;;  %295 = vmatpush.msra.mxu3 %v165_v40  ;;  %v1144_v10 = vld [vmem:[%s1241_s0 + $0x18] sm:$0xff] }
  0x27   :  { %v108_v43 = vld [vmem:[#allocation3 + $0x80] sm:$0xff]  ;;  %223 = vmatpush.msra.mxu0 %v112_v39  ;;  %269 = vmatpush.msra.mxu2 %v113_v41  ;;  %v157_v48 = vld [vmem:[#allocation3 + $0x208] sm:$0xff]  ;;  %v118_v11 = vld [vmem:[#allocation3 + $0xd0] sm:$0xff] }
  0x28   :  { %305 = vmatpush.msrb.mxu1 %v154_v38  ;;  %v104_v47 = vld [vmem:[#allocation3 + $0x60] sm:$0xff]  ;;  %v105_v49 = vld [vmem:[#allocation3 + $0x68] sm:$0xff]  ;;  %296 = vmatpush.msra.mxu3 %v161_v44  ;;  %v174_v12 = vld [vmem:[#allocation3 + $0x290] sm:$0xff] }
  0x29   :  { %224 = vmatpush.msra.mxu0 %v108_v43  ;;  %270 = vmatpush.msra.mxu2 %v109_v45  ;;  %v100_v51 = vld [vmem:[#allocation3 + $0x40] sm:$0xff]  ;;  %v101_v53 = vld [vmem:[#allocation3 + $0x48] sm:$0xff]  ;;  %v143_v13 = vld [vmem:[#allocation3 + $0x198] sm:$0xff] }
  0x2a   :  { %306 = vmatpush.msrb.mxu1 %v150_v42  ;;  %297 = vmatpush.msra.mxu3 %v157_v48  ;;  %v96_v55 = vld [vmem:[#allocation3 + $0x20] sm:$0xff]  ;;  %v97_v57 = vld [vmem:[#allocation3 + $0x28] sm:$0xff]  ;;  %v114_v15 = vld [vmem:[#allocation3 + $0xb0] sm:$0xff] }
  0x2b   :  { %225 = vmatpush.msra.mxu0 %v104_v47  ;;  %271 = vmatpush.msra.mxu2 %v105_v49  ;;  %v92_v59 = vld [vmem:[#allocation3] sm:$0xff]  ;;  %v93_v61 = vld [vmem:[#allocation3 + $0x8] sm:$0xff]  ;;  %v170_v16 = vld [vmem:[#allocation3 + $0x270] sm:$0xff] }
  0x2c   :  { %307 = vmatpush.msrb.mxu1 %v146_v46  ;;  %334 = vmatpush.msrb.mxu3 %v194_v52  ;;  %v1128_v60 = vld [vmem:[%s1241_s0 + $0x8] sm:$0xff]  ;;  %v1133_v62 = vld [vmem:[%s1241_s0] sm:$0xff]  ;;  %v1149_v14 = vld [vmem:[%s1241_s0 + $0x10] sm:$0xff] }
  0x2d   :  { %226 = vmatpush.msra.mxu0 %v100_v51  ;;  %272 = vmatpush.msra.mxu2 %v101_v53  ;;  %v139_v17 = vld [vmem:[#allocation3 + $0x178] sm:$0xff]  ;;  %v110_v19 = vld [vmem:[#allocation3 + $0x90] sm:$0xff]  ;;  %v433_v38 = vld [vmem:[#allocation6 + $0xe0] sm:$0xff] }
  0x2e   :  { %308 = vmatpush.msrb.mxu1 %v142_v50  ;;  %335 = vmatpush.msrb.mxu3 %v190_v56  ;;  %v187_v18 = vld [vmem:[#allocation3 + $0x2f8] sm:$0xff]  ;;  %v166_v20 = vld [vmem:[#allocation3 + $0x250] sm:$0xff]  ;;  %v429_v45 = vld [vmem:[#allocation6 + $0xc0] sm:$0xff] }
  0x2f   :  { %227 = vmatpush.msra.mxu0 %v96_v55  ;;  %273 = vmatpush.msra.mxu2 %v97_v57  ;;  %v135_v21 = vld [vmem:[#allocation3 + $0x158] sm:$0xff]  ;;  %v106_v23 = vld [vmem:[#allocation3 + $0x70] sm:$0xff]  ;;  %v465_v48 = vld [vmem:[#allocation6 + $0x1e0] sm:$0xff] }
  0x30   :  { %309 = vmatpush.msrb.mxu1 %v138_v54  ;;  %917 = vmatmul.msk.f32.vlgmr.msra.gmra.mxu3 %vm206_vm0, %v1128_v60  ;;  %v183_v22 = vld [vmem:[#allocation3 + $0x2d8] sm:$0xff]  ;;  %v162_v24 = vld [vmem:[#allocation3 + $0x230] sm:$0xff]  ;;  %v425_v50 = vld [vmem:[#allocation6 + $0xa0] sm:$0xff] }
  0x31   :  { %228 = vmatpush.msra.mxu0 %v92_v59  ;;  %274 = vmatpush.msra.mxu2 %v93_v61  ;;  %v131_v25 = vld [vmem:[#allocation3 + $0x138] sm:$0xff]  ;;  %v102_v27 = vld [vmem:[#allocation3 + $0x50] sm:$0xff]  ;;  %v461_v55 = vld [vmem:[#allocation6 + $0x1c0] sm:$0xff] }
  0x32   :  { %310 = vmatpush.msrb.mxu1 %v134_v58  ;;  %229 = vmatmul.f32.vlgmr.msra.gmra.mxu0 %v1133_v62  ;;  %v179_v26 = vld [vmem:[#allocation3 + $0x2b8] sm:$0xff]  ;;  %v158_v28 = vld [vmem:[#allocation3 + $0x210] sm:$0xff]  ;;  %v497_v57 = vld [vmem:[#allocation6 + $0x2e0] sm:$0xff] }
  0x33   :  { %275 = vmatmul.f32.vlgmr.msra.gmra.mxu2 %v1133_v62  ;;  %336 = vmatpush.msrb.mxu3 %v186_v0  ;;  %v127_v29 = vld [vmem:[#allocation3 + $0x118] sm:$0xff]  ;;  %v98_v30 = vld [vmem:[#allocation3 + $0x30] sm:$0xff]  ;;  %v421_v58 = vld [vmem:[#allocation6 + $0x80] sm:$0xff] }
  0x34   :  { %311 = vmatpush.msrb.mxu1 %v130_v63  ;;  %351 = vmatpush.msrb.mxu0 %v155_v1  ;;  %v175_v31 = vld [vmem:[#allocation3 + $0x298] sm:$0xff]  ;;  %v435_v33 = vld [vmem:[#allocation6 + $0xf0] sm:$0xff]  ;;  %v457_v63 = vld [vmem:[#allocation6 + $0x1a0] sm:$0xff] }
  0x35   :  { %915 = vmatmul.msk.f32.vlgmr.msra.gmra.mxu1 %vm206_vm0, %v1128_v60  ;;  %380 = vmatpush.msrb.mxu2 %v195_v2  ;;  %v123_v32 = vld [vmem:[#allocation3 + $0xf8] sm:$0xff]  ;;  %v94_v34 = vld [vmem:[#allocation3 + $0x10] sm:$0xff]  ;;  %v417_v1 = vld [vmem:[#allocation6 + $0x60] sm:$0xff] }
  0x36   :  { %312 = vmatpush.msrb.mxu1 %v126_v3  ;;  %337 = vmatpush.msrb.mxu3 %v182_v4  ;;  %v171_v35 = vld [vmem:[#allocation3 + $0x278] sm:$0xff]  ;;  %v467_v40 = vld [vmem:[#allocation6 + $0x1f0] sm:$0xff]  ;;  %v493_v2 = vld [vmem:[#allocation6 + $0x2c0] sm:$0xff] }
  0x37   :  { %352 = vmatpush.msrb.mxu0 %v151_v5  ;;  %381 = vmatpush.msrb.mxu2 %v191_v6  ;;  %v119_v36 = vld [vmem:[#allocation3 + $0xd8] sm:$0xff]  ;;  %v431_v42 = vld [vmem:[#allocation6 + $0xd0] sm:$0xff]  ;;  %v529_v4 = vld [vmem:[#allocation6 + $0x3e0] sm:$0xff] }
  0x38   :  { %313 = vmatpush.msrb.mxu1 %v122_v7  ;;  %338 = vmatpush.msrb.mxu3 %v178_v8  ;;  %v167_v37 = vld [vmem:[#allocation3 + $0x258] sm:$0xff]  ;;  %v427_v47 = vld [vmem:[#allocation6 + $0xb0] sm:$0xff]  ;;  %v453_v7 = vld [vmem:[#allocation6 + $0x180] sm:$0xff] }
  0x39   :  { %353 = vmatpush.msrb.mxu0 %v147_v9  ;;  %918 = vmatmul.msk.f32.gmra.mxu3 %vm206_vm0, %v1144_v10  ;;  %v115_v39 = vld [vmem:[#allocation3 + $0xb8] sm:$0xff]  ;;  %v463_v51 = vld [vmem:[#allocation6 + $0x1d0] sm:$0xff]  ;;  %v413_v8 = vld [vmem:[#allocation6 + $0x40] sm:$0xff] }
  0x3a   :  { %314 = vmatpush.msrb.mxu1 %v118_v11  ;;  %339 = vmatpush.msrb.mxu3 %v174_v12  ;;  %v163_v41 = vld [vmem:[#allocation3 + $0x238] sm:$0xff]  ;;  %v499_v53 = vld [vmem:[#allocation6 + $0x2f0] sm:$0xff]  ;;  %v525_v12 = vld [vmem:[#allocation6 + $0x3c0] sm:$0xff] }
  0x3b   :  { %354 = vmatpush.msrb.mxu0 %v143_v13  ;;  %278 = vmatmul.f32.gmra.mxu2 %v1149_v14  ;;  %v111_v43 = vld [vmem:[#allocation3 + $0x98] sm:$0xff]  ;;  %v423_v54 = vld [vmem:[#allocation6 + $0x90] sm:$0xff]  ;;  %v449_v13 = vld [vmem:[#allocation6 + $0x160] sm:$0xff] }
  0x3c   :  { %232 = vmatmul.f32.gmra.mxu0 %v1149_v14  ;;  %315 = vmatpush.msrb.mxu1 %v114_v15  ;;  %v159_v44 = vld [vmem:[#allocation3 + $0x218] sm:$0xff]  ;;  %v459_v59 = vld [vmem:[#allocation6 + $0x1b0] sm:$0xff] }
  0x3d   :  { %340 = vmatpush.msrb.mxu3 %v170_v16  ;;  %355 = vmatpush.msrb.mxu0 %v139_v17  ;;  %v107_v46 = vld [vmem:[#allocation3 + $0x78] sm:$0xff]  ;;  %v495_v61 = vld [vmem:[#allocation6 + $0x2d0] sm:$0xff]  ;;  %v409_v16 = vld [vmem:[#allocation6 + $0x20] sm:$0xff] }
  0x3e   :  { %916 = vmatmul.msk.f32.gmra.mxu1 %vm206_vm0, %v1144_v10  ;;  %382 = vmatpush.msrb.mxu2 %v187_v18  ;;  %v103_v49 = vld [vmem:[#allocation3 + $0x58] sm:$0xff]  ;;  %v531_v0 = vld [vmem:[#allocation6 + $0x3f0] sm:$0xff]  ;;  %v485_v18 = vld [vmem:[#allocation6 + $0x280] sm:$0xff] }
  0x3f   :  { %316 = vmatpush.msrb.mxu1 %v110_v19  ;;  %341 = vmatpush.msrb.mxu3 %v166_v20  ;;  %v99_v52 = vld [vmem:[#allocation3 + $0x38] sm:$0xff]  ;;  %v455_v3 = vld [vmem:[#allocation6 + $0x190] sm:$0xff]  ;;  %v445_v20 = vld [vmem:[#allocation6 + $0x140] sm:$0xff] }
  0x40   :  { %356 = vmatpush.msrb.mxu0 %v135_v21  ;;  %383 = vmatpush.msrb.mxu2 %v183_v22  ;;  %v95_v56 = vld [vmem:[#allocation3 + $0x18] sm:$0xff]  ;;  %v415_v5 = vld [vmem:[#allocation6 + $0x50] sm:$0xff]  ;;  %v405_v22 = vld [vmem:[#allocation6] sm:$0xff] }
  0x41   :  { %317 = vmatpush.msrb.mxu1 %v106_v23  ;;  %342 = vmatpush.msrb.mxu3 %v162_v24  ;;  %v491_v6 = vld [vmem:[#allocation6 + $0x2b0] sm:$0xff]  ;;  %v436_v23 = vld [vmem:[#allocation6 + $0xf8] sm:$0xff]  ;;  %v481_v24 = vld [vmem:[#allocation6 + $0x260] sm:$0xff] }
  0x42   :  { %357 = vmatpush.msrb.mxu0 %v131_v25  ;;  %384 = vmatpush.msrb.mxu2 %v179_v26  ;;  %v451_v9 = vld [vmem:[#allocation6 + $0x170] sm:$0xff]  ;;  %v441_v25 = vld [vmem:[#allocation6 + $0x120] sm:$0xff]  ;;  %v434_v26 = vld [vmem:[#allocation6 + $0xe8] sm:$0xff] }
  0x43   :  { %318 = vmatpush.msrb.mxu1 %v102_v27  ;;  %343 = vmatpush.msrb.mxu3 %v158_v28  ;;  %v411_v11 = vld [vmem:[#allocation6 + $0x30] sm:$0xff]  ;;  %v432_v28 = vld [vmem:[#allocation6 + $0xd8] sm:$0xff] }
  0x44   :  { %358 = vmatpush.msrb.mxu0 %v127_v29  ;;  %919 = vmatmul.msk.f32.vlgmr.msrb.gmra.mxu3 %vm206_vm0, %v1128_v60  ;;  %v487_v15 = vld [vmem:[#allocation6 + $0x290] sm:$0xff]  ;;  %v437_v29 = vld [vmem:[#allocation6 + $0x100] sm:$0xff] }
  0x45   :  { %319 = vmatpush.msrb.mxu1 %v98_v30  ;;  %385 = vmatpush.msrb.mxu2 %v175_v31  ;;  %v447_v17 = vld [vmem:[#allocation6 + $0x150] sm:$0xff]  ;;  %v430_v30 = vld [vmem:[#allocation6 + $0xc8] sm:$0xff]  ;;  %v468_v31 = vld [vmem:[#allocation6 + $0x1f8] sm:$0xff] }
  0x46   :  { %359 = vmatpush.msrb.mxu0 %v123_v32  ;;  %539 = vmatpush.msra.mxu3 %v435_v33  ;;  %v407_v19 = vld [vmem:[#allocation6 + $0x10] sm:$0xff] }
  0x47   :  { %320 = vmatpush.msrb.mxu1 %v94_v34  ;;  %386 = vmatpush.msrb.mxu2 %v171_v35  ;;  %v483_v21 = vld [vmem:[#allocation6 + $0x270] sm:$0xff]  ;;  %v428_v34 = vld [vmem:[#allocation6 + $0xb8] sm:$0xff]  ;;  %v466_v35 = vld [vmem:[#allocation6 + $0x1e8] sm:$0xff] }
  0x48   :  { %360 = vmatpush.msrb.mxu0 %v119_v36  ;;  %321 = vmatmul.f32.vlgmr.msrb.gmra.mxu1 %v1133_v62  ;;  %v439_v27 = vld [vmem:[#allocation6 + $0x110] sm:$0xff]  ;;  %v477_v36 = vld [vmem:[#allocation6 + $0x240] sm:$0xff] }
  0x49   :  { %387 = vmatpush.msrb.mxu2 %v167_v37  ;;  %540 = vmatpush.msra.mxu3 %v433_v38  ;;  %v479_v32 = vld [vmem:[#allocation6 + $0x250] sm:$0xff]  ;;  %v521_v37 = vld [vmem:[#allocation6 + $0x3a0] sm:$0xff]  ;;  %v426_v38 = vld [vmem:[#allocation6 + $0xa8] sm:$0xff] }
  0x4a   :  { %361 = vmatpush.msrb.mxu0 %v115_v39  ;;  %562 = vmatpush.msra.mxu1 %v467_v40  ;;  %v523_v33 = vld [vmem:[#allocation6 + $0x3b0] sm:$0xff]  ;;  %v464_v39 = vld [vmem:[#allocation6 + $0x1d8] sm:$0xff] }
  0x4b   :  { %388 = vmatpush.msrb.mxu2 %v163_v41  ;;  %541 = vmatpush.msra.mxu3 %v431_v42  ;;  %v475_v40 = vld [vmem:[#allocation6 + $0x230] sm:$0xff]  ;;  %v424_v42 = vld [vmem:[#allocation6 + $0x98] sm:$0xff] }
  0x4c   :  { %362 = vmatpush.msrb.mxu0 %v111_v43  ;;  %920 = vmatmul.msk.f32.gmra.mxu3 %vm206_vm0, %v1144_v10  ;;  %v519_v41 = vld [vmem:[#allocation6 + $0x390] sm:$0xff]  ;;  %v462_v43 = vld [vmem:[#allocation6 + $0x1c8] sm:$0xff] }
  0x4d   :  { %389 = vmatpush.msrb.mxu2 %v159_v44  ;;  %542 = vmatpush.msra.mxu3 %v429_v45  ;;  %v473_v44 = vld [vmem:[#allocation6 + $0x220] sm:$0xff] }
  0x4e   :  { %363 = vmatpush.msrb.mxu0 %v107_v46  ;;  %921 = vmatmul.msk.f32.vlgmr.msrb.gmra.mxu2 %vm206_vm0, %v1128_v60  ;;  %v419_v60 = vld [vmem:[#allocation6 + $0x70] sm:$0xff]  ;;  %v517_v45 = vld [vmem:[#allocation6 + $0x380] sm:$0xff]  ;;  %v422_v46 = vld [vmem:[#allocation6 + $0x88] sm:$0xff] }
  0x4f   :  { %543 = vmatpush.msra.mxu3 %v427_v47  ;;  %563 = vmatpush.msra.mxu1 %v465_v48  ;;  %v460_v47 = vld [vmem:[#allocation6 + $0x1b8] sm:$0xff]  ;;  %v471_v48 = vld [vmem:[#allocation6 + $0x210] sm:$0xff] }
  0x50   :  { %364 = vmatpush.msrb.mxu0 %v103_v49  ;;  %324 = vmatmul.f32.gmra.mxu1 %v1149_v14  ;;  %v515_v49 = vld [vmem:[#allocation6 + $0x370] sm:$0xff] }
  0x51   :  { %544 = vmatpush.msra.mxu3 %v425_v50  ;;  %564 = vmatpush.msra.mxu1 %v463_v51  ;;  %v420_v50 = vld [vmem:[#allocation6 + $0x78] sm:$0xff]  ;;  %v458_v51 = vld [vmem:[#allocation6 + $0x1a8] sm:$0xff] }
  0x52   :  { %365 = vmatpush.msrb.mxu0 %v99_v52  ;;  %585 = vmatpush.msra.mxu2 %v499_v53  ;;  %v469_v52 = vld [vmem:[#allocation6 + $0x200] sm:$0xff] }
  0x53   :  { %545 = vmatpush.msra.mxu3 %v423_v54  ;;  %565 = vmatpush.msra.mxu1 %v461_v55  ;;  %v513_v53 = vld [vmem:[#allocation6 + $0x360] sm:$0xff]  ;;  %v418_v54 = vld [vmem:[#allocation6 + $0x68] sm:$0xff]  ;;  %v456_v55 = vld [vmem:[#allocation6 + $0x198] sm:$0xff] }
  0x54   :  { %366 = vmatpush.msrb.mxu0 %v95_v56  ;;  %586 = vmatpush.msra.mxu2 %v497_v57  ;;  %v500_v56 = vld [vmem:[#allocation6 + $0x2f8] sm:$0xff]  ;;  %v511_v57 = vld [vmem:[#allocation6 + $0x350] sm:$0xff] }
  0x55   :  { %367 = vmatmul.f32.vlgmr.msrb.gmra.mxu0 %v1133_v62  ;;  %546 = vmatpush.msra.mxu3 %v421_v58  ;;  %v527_v62 = vld [vmem:[#allocation6 + $0x3d0] sm:$0xff]  ;;  %v416_v58 = vld [vmem:[#allocation6 + $0x58] sm:$0xff] }
  0x56   :  { %922 = vmatmul.msk.f32.gmra.mxu2 %vm206_vm0, %v1144_v10  ;;  %566 = vmatpush.msra.mxu1 %v459_v59  ;;  %v489_v10 = vld [vmem:[#allocation6 + $0x2a0] sm:$0xff]  ;;  %v454_v59 = vld [vmem:[#allocation6 + $0x188] sm:$0xff] }
  0x57   :  { %547 = vmatpush.msra.mxu3 %v419_v60  ;;  %587 = vmatpush.msra.mxu2 %v495_v61  ;;  %v498_v60 = vld [vmem:[#allocation6 + $0x2e8] sm:$0xff]  ;;  %v509_v61 = vld [vmem:[#allocation6 + $0x340] sm:$0xff] }
  0x58   :  { %567 = vmatpush.msra.mxu1 %v457_v63  ;;  %608 = vmatpush.msra.mxu0 %v531_v0  ;;  %v414_v63 = vld [vmem:[#allocation6 + $0x48] sm:$0xff]  ;;  %v452_v0 = vld [vmem:[#allocation6 + $0x178] sm:$0xff] }
  0x59   :  { %548 = vmatpush.msra.mxu3 %v417_v1  ;;  %588 = vmatpush.msra.mxu2 %v493_v2  ;;  %v496_v1 = vld [vmem:[#allocation6 + $0x2d8] sm:$0xff]  ;;  %v507_v2 = vld [vmem:[#allocation6 + $0x330] sm:$0xff] }
  0x5a   :  { %568 = vmatpush.msra.mxu1 %v455_v3  ;;  %609 = vmatpush.msra.mxu0 %v529_v4  ;;  %v412_v3 = vld [vmem:[#allocation6 + $0x38] sm:$0xff]  ;;  %v450_v4 = vld [vmem:[#allocation6 + $0x168] sm:$0xff] }
  0x5b   :  { %549 = vmatpush.msra.mxu3 %v415_v5  ;;  %589 = vmatpush.msra.mxu2 %v491_v6  ;;  %v494_v5 = vld [vmem:[#allocation6 + $0x2c8] sm:$0xff]  ;;  %v505_v6 = vld [vmem:[#allocation6 + $0x320] sm:$0xff] }
  0x5c   :  { %569 = vmatpush.msra.mxu1 %v453_v7  ;;  %610 = vmatpush.msra.mxu0 %v527_v62  ;;  %v410_v7 = vld [vmem:[#allocation6 + $0x28] sm:$0xff]  ;;  %v448_v62 = vld [vmem:[#allocation6 + $0x158] sm:$0xff] }
  0x5d   :  { %370 = vmatmul.f32.gmra.mxu0 %v1149_v14  ;;  %550 = vmatpush.msra.mxu3 %v413_v8  ;;  %v443_v14 = vld [vmem:[#allocation6 + $0x130] sm:$0xff]  ;;  %v492_v8 = vld [vmem:[#allocation6 + $0x2b8] sm:$0xff] }
  0x5e   :  { %570 = vmatpush.msra.mxu1 %v451_v9  ;;  %590 = vmatpush.msra.mxu2 %v489_v10  ;;  %v503_v9 = vld [vmem:[#allocation6 + $0x310] sm:$0xff]  ;;  %v408_v10 = vld [vmem:[#allocation6 + $0x18] sm:$0xff] }
  0x5f   :  { %551 = vmatpush.msra.mxu3 %v411_v11  ;;  %611 = vmatpush.msra.mxu0 %v525_v12  ;;  %v446_v11 = vld [vmem:[#allocation6 + $0x148] sm:$0xff] }
  0x60   :  { %571 = vmatpush.msra.mxu1 %v449_v13  ;;  %591 = vmatpush.msra.mxu2 %v487_v15  ;;  %v490_v12 = vld [vmem:[#allocation6 + $0x2a8] sm:$0xff]  ;;  %v501_v13 = vld [vmem:[#allocation6 + $0x300] sm:$0xff] }
  0x61   :  { %552 = vmatpush.msra.mxu3 %v409_v16  ;;  %612 = vmatpush.msra.mxu0 %v523_v33  ;;  %v406_v15 = vld [vmem:[#allocation6 + $0x8] sm:$0xff]  ;;  %v444_v16 = vld [vmem:[#allocation6 + $0x138] sm:$0xff] }
  0x62   :  { %572 = vmatpush.msra.mxu1 %v447_v17  ;;  %592 = vmatpush.msra.mxu2 %v485_v18  ;;  %v1172_v17 = vld [vmem:[%s1243_s2] sm:$0xf] }
  0x63   :  { %553 = vmatpush.msra.mxu3 %v407_v19  ;;  %613 = vmatpush.msra.mxu0 %v521_v37  ;;  %v488_v18 = vld [vmem:[#allocation6 + $0x298] sm:$0xff]  ;;  %v522_v37 = vld [vmem:[#allocation6 + $0x3a8] sm:$0xff] }
  0x64   :  { %573 = vmatpush.msra.mxu1 %v445_v20  ;;  %593 = vmatpush.msra.mxu2 %v483_v21  ;;  %v532_v19 = vld [vmem:[#allocation6 + $0x3f8] sm:$0xff]  ;;  %v442_v20 = vld [vmem:[#allocation6 + $0x128] sm:$0xff] }
  0x65   :  { %554 = vmatpush.msra.mxu3 %v405_v22  ;;  %614 = vmatpush.msra.mxu0 %v519_v41  ;;  %v486_v21 = vld [vmem:[#allocation6 + $0x288] sm:$0xff]  ;;  %v520_v41 = vld [vmem:[#allocation6 + $0x398] sm:$0xff] }
  0x66   :  { %574 = vmatpush.msra.mxu1 %v443_v14  ;;  %594 = vmatpush.msra.mxu2 %v481_v24  ;;  %v530_v22 = vld [vmem:[#allocation6 + $0x3e8] sm:$0xff]  ;;  %v198_v14 = vperm.slane %v1172_v17, 0  ;;  %v484_v24 = vld [vmem:[#allocation6 + $0x278] sm:$0xff] }
  0x67   :  { %631 = vmatpush.msrb.mxu3 %v436_v23  ;;  %615 = vmatpush.msra.mxu0 %v517_v45  ;;  %v440_v23 = vld [vmem:[#allocation6 + $0x118] sm:$0xff]  ;;  %v518_v45 = vld [vmem:[#allocation6 + $0x388] sm:$0xff] }
  0x68   :  { %575 = vmatpush.msra.mxu1 %v441_v25  ;;  %595 = vmatpush.msra.mxu2 %v479_v32  ;;  %v528_v25 = vld [vmem:[#allocation6 + $0x3d8] sm:$0xff] }
  0x69   :  { %632 = vmatpush.msrb.mxu3 %v434_v26  ;;  %616 = vmatpush.msra.mxu0 %v515_v49  ;;  %v438_v26 = vld [vmem:[#allocation6 + $0x108] sm:$0xff]  ;;  %v524_v32 = vld [vmem:[#allocation6 + $0x3b8] sm:$0xff] }
  0x6a   :  { %576 = vmatpush.msra.mxu1 %v439_v27  ;;  %596 = vmatpush.msra.mxu2 %v477_v36  ;;  %v478_v36 = vld [vmem:[#allocation6 + $0x248] sm:$0xff]  ;;  %v516_v49 = vld [vmem:[#allocation6 + $0x378] sm:$0xff] }
  0x6b   :  { %633 = vmatpush.msrb.mxu3 %v432_v28  ;;  %617 = vmatpush.msra.mxu0 %v513_v53  ;;  %v482_v28 = vld [vmem:[#allocation6 + $0x268] sm:$0xff] }
  0x6c   :  { %577 = vmatpush.msra.mxu1 %v437_v29  ;;  %597 = vmatpush.msra.mxu2 %v475_v40  ;;  %v526_v29 = vld [vmem:[#allocation6 + $0x3c8] sm:$0xff]  ;;  %v476_v40 = vld [vmem:[#allocation6 + $0x238] sm:$0xff] }
  0x6d   :  { %634 = vmatpush.msrb.mxu3 %v430_v30  ;;  %618 = vmatpush.msra.mxu0 %v511_v57  ;;  %v470_v53 = vld [vmem:[#allocation6 + $0x208] sm:$0xff]  ;;  %v512_v57 = vld [vmem:[#allocation6 + $0x358] sm:$0xff] }
  0x6e   :  { %654 = vmatpush.msrb.mxu1 %v468_v31  ;;  %598 = vmatpush.msra.mxu2 %v473_v44  ;;  %v480_v31 = vld [vmem:[#allocation6 + $0x258] sm:$0xff]  ;;  %v474_v44 = vld [vmem:[#allocation6 + $0x228] sm:$0xff] }
  0x6f   :  { %635 = vmatpush.msrb.mxu3 %v428_v34  ;;  %619 = vmatpush.msra.mxu0 %v509_v61  ;;  %v510_v61 = vld [vmem:[#allocation6 + $0x348] sm:$0xff] }
  0x70   :  { %655 = vmatpush.msrb.mxu1 %v466_v35  ;;  %599 = vmatpush.msra.mxu2 %v471_v48  ;;  %v199_v35 = vperm.slane %v1172_v17, 1  ;;  %v472_v48 = vld [vmem:[#allocation6 + $0x218] sm:$0xff] }
  0x71   :  { %636 = vmatpush.msrb.mxu3 %v426_v38  ;;  %620 = vmatpush.msra.mxu0 %v507_v2 }
  0x72   :  { %656 = vmatpush.msrb.mxu1 %v464_v39  ;;  %600 = vmatpush.msra.mxu2 %v469_v52 }
  0x73   :  { %637 = vmatpush.msrb.mxu3 %v424_v42  ;;  %621 = vmatpush.msra.mxu0 %v505_v6 }
  0x74   :  { %657 = vmatpush.msrb.mxu1 %v462_v43  ;;  %677 = vmatpush.msrb.mxu2 %v500_v56 }
  0x75   :  { %638 = vmatpush.msrb.mxu3 %v422_v46  ;;  %622 = vmatpush.msra.mxu0 %v503_v9 }
  0x76   :  { %658 = vmatpush.msrb.mxu1 %v460_v47  ;;  %678 = vmatpush.msrb.mxu2 %v498_v60 }
  0x77   :  { %639 = vmatpush.msrb.mxu3 %v420_v50  ;;  %623 = vmatpush.msra.mxu0 %v501_v13  ;;  %v201_v13 = vperm.slane %v1172_v17, 3 }
  0x78   :  { %659 = vmatpush.msrb.mxu1 %v458_v51  ;;  %679 = vmatpush.msrb.mxu2 %v496_v1  ;;  %v200_v1 = vperm.slane %v1172_v17, 2  ;;  %v741_v17 = vld [vmem:[#allocation8 + $0x70] sm:$0xff] }
  0x79   :  { %640 = vmatpush.msrb.mxu3 %v418_v54  ;;  %700 = vmatpush.msrb.mxu0 %v532_v19  ;;  %v514_v54 = vld [vmem:[#allocation6 + $0x368] sm:$0xff] }
  0x7a   :  { %660 = vmatpush.msrb.mxu1 %v456_v55  ;;  %680 = vmatpush.msrb.mxu2 %v494_v5  ;;  %v504_v5 = vld [vmem:[#allocation6 + $0x318] sm:$0xff] }
  0x7b   :  { %641 = vmatpush.msrb.mxu3 %v416_v58  ;;  %701 = vmatpush.msrb.mxu0 %v530_v22 }
  0x7c   :  { %661 = vmatpush.msrb.mxu1 %v454_v59  ;;  %681 = vmatpush.msrb.mxu2 %v492_v8 }
  0x7d   :  { %642 = vmatpush.msrb.mxu3 %v414_v63  ;;  %702 = vmatpush.msrb.mxu0 %v528_v25 }
  0x7e   :  { %662 = vmatpush.msrb.mxu1 %v452_v0  ;;  %682 = vmatpush.msrb.mxu2 %v490_v12  ;;  %v508_v0 = vld [vmem:[#allocation6 + $0x338] sm:$0xff] }
  0x7f   :  { %643 = vmatpush.msrb.mxu3 %v412_v3  ;;  %703 = vmatpush.msrb.mxu0 %v526_v29  ;;  %v506_v3 = vld [vmem:[#allocation6 + $0x328] sm:$0xff]  ;;  %v739_v29 = vld [vmem:[#allocation8 + $0x60] sm:$0xff] }
  0x80   :  { %663 = vmatpush.msrb.mxu1 %v450_v4  ;;  %683 = vmatpush.msrb.mxu2 %v488_v18  ;;  %v742_v18 = vld [vmem:[#allocation8 + $0x78] sm:$0xff] }
  0x81   :  { %644 = vmatpush.msrb.mxu3 %v410_v7  ;;  %704 = vmatpush.msrb.mxu0 %v524_v32  ;;  %v736_v32 = vld [vmem:[#allocation8 + $0x48] sm:$0xff] }
  0x82   :  { %664 = vmatpush.msrb.mxu1 %v448_v62  ;;  %684 = vmatpush.msrb.mxu2 %v486_v21  ;;  %v502_v62 = vld [vmem:[#allocation6 + $0x308] sm:$0xff] }
  0x83   :  { %645 = vmatpush.msrb.mxu3 %v408_v10  ;;  %705 = vmatpush.msrb.mxu0 %v522_v37  ;;  %v757_v37 = vld [vmem:[#allocation8 + $0xf0] sm:$0xff] }
  0x84   :  { %665 = vmatpush.msrb.mxu1 %v446_v11  ;;  %685 = vmatpush.msrb.mxu2 %v484_v24 }
  0x85   :  { %646 = vmatpush.msrb.mxu3 %v406_v15  ;;  %706 = vmatpush.msrb.mxu0 %v520_v41  ;;  %v755_v41 = vld [vmem:[#allocation8 + $0xe0] sm:$0xff] }
  0x86   :  { %666 = vmatpush.msrb.mxu1 %v444_v16  ;;  %686 = vmatpush.msrb.mxu2 %v482_v28  ;;  %v740_v28 = vld [vmem:[#allocation8 + $0x68] sm:$0xff] }
  0x87   :  { %707 = vmatpush.msrb.mxu0 %v518_v45  ;;  %v753_v45 = vld [vmem:[#allocation8 + $0xd0] sm:$0xff] }
  0x88   :  { %667 = vmatpush.msrb.mxu1 %v442_v20  ;;  %687 = vmatpush.msrb.mxu2 %v480_v31  ;;  %v737_v31 = vld [vmem:[#allocation8 + $0x50] sm:$0xff] }
  0x89   :  { %708 = vmatpush.msrb.mxu0 %v516_v49  ;;  %v751_v49 = vld [vmem:[#allocation8 + $0xc0] sm:$0xff] }
  0x8a   :  { %668 = vmatpush.msrb.mxu1 %v440_v23  ;;  %688 = vmatpush.msrb.mxu2 %v478_v36  ;;  %v733_v36 = vld [vmem:[#allocation8 + $0x30] sm:$0xff] }
  0x8b   :  { %709 = vmatpush.msrb.mxu0 %v514_v54  ;;  %v746_v54 = vld [vmem:[#allocation8 + $0x98] sm:$0xff] }
  0x8c   :  { %669 = vmatpush.msrb.mxu1 %v438_v26  ;;  %689 = vmatpush.msrb.mxu2 %v476_v40  ;;  %v731_v40 = vld [vmem:[#allocation8 + $0x20] sm:$0xff] }
  0x8d   :  { %710 = vmatpush.msrb.mxu0 %v512_v57  ;;  %v744_v57 = vld [vmem:[#allocation8 + $0x88] sm:$0xff] }
  0x8e   :  { %690 = vmatpush.msrb.mxu2 %v474_v44  ;;  %v729_v44 = vld [vmem:[#allocation8 + $0x10] sm:$0xff] }
  0x8f   :  { %711 = vmatpush.msrb.mxu0 %v510_v61 }
  0x90   :  { %691 = vmatpush.msrb.mxu2 %v472_v48  ;;  %v727_v48 = vld [vmem:[#allocation8] sm:$0xff] }
  0x91   :  { %712 = vmatpush.msrb.mxu0 %v508_v0 }
  0x92   :  { %692 = vmatpush.msrb.mxu2 %v470_v53  ;;  %v747_v53 = vld [vmem:[#allocation8 + $0xa0] sm:$0xff] }
  0x93   :  { %713 = vmatpush.msrb.mxu0 %v506_v3  ;;  %v826_v3 = vld [vmem:[%s1248_s7 + $0x78] sm:$0xff] }
  0x95   :  { %714 = vmatpush.msrb.mxu0 %v504_v5 }
  0x97   :  { %715 = vmatpush.msrb.mxu0 %v502_v62 }
  0xaf   :  { %v230_v27 = vpop.f32.mrf.mxu0 }
  0xb0   :  { %v231_v30 = vadd.f32 %v230_v27, %v198_v14 }
  0xb2   :  { %v253_v33 = vpop.f32.mrf.mxu1 }
  0xb3   :  { %v254_v34 = vadd.f32 %v253_v33, %v231_v30  ;;  %v299_v38 = vpop.f32.mrf.mxu3  ;;  %v738_v30 = vld [vmem:[#allocation8 + $0x58] sm:$0xff]  ;;  %v735_v33 = vld [vmem:[#allocation8 + $0x40] sm:$0xff] }
  0xb5   :  { %v397_v39 = vmax.f32 %v254_v34, 0.0  ;;  %v758_v34 = vld [vmem:[#allocation8 + $0xf8] sm:$0xff] }
  0xb6   :  { %v276_v42 = vpop.f32.mrf.mxu2 }
  0xb7   :  { %v277_v43 = vadd.f32 %v276_v42, %v199_v35  ;;  %555 = vmatmul.f32.vlgmr.msra.gmra.mxu3 %v397_v39  ;;  %v730_v42 = vld [vmem:[#allocation8 + $0x18] sm:$0xff] }
  0xb8   :  { %763 = vmatpush.msra.mxu3 %v742_v18 }
  0xb9   :  { %v300_v46 = vadd.f32 %v299_v38, %v277_v43  ;;  %v233_v47 = vpop.f32.mrf.mxu0  ;;  %v732_v38 = vld [vmem:[#allocation8 + $0x28] sm:$0xff]  ;;  %v754_v43 = vld [vmem:[#allocation8 + $0xd8] sm:$0xff] }
  0xba   :  { %v234_v50 = vadd.f32 %v233_v47, %v198_v14  ;;  %764 = vmatpush.msra.mxu3 %v741_v17  ;;  %v752_v47 = vld [vmem:[#allocation8 + $0xc8] sm:$0xff] }
  0xbb   :  { %v398_v51 = vmax.f32 %v300_v46, 0.0  ;;  %v256_v52 = vpop.f32.mrf.mxu1  ;;  %v728_v46 = vld [vmem:[#allocation8 + $0x8] sm:$0xff] }
  0xbc   :  { %v257_v55 = vadd.f32 %v256_v52, %v234_v50  ;;  %v302_v56 = vpop.f32.mrf.mxu3  ;;  %765 = vmatpush.msra.mxu3 %v740_v28  ;;  %v750_v50 = vld [vmem:[#allocation8 + $0xb8] sm:$0xff]  ;;  %v748_v52 = vld [vmem:[#allocation8 + $0xa8] sm:$0xff] }
  0xbd   :  { %578 = vmatmul.f32.vlgmr.msra.gmra.mxu1 %v398_v51 }
  0xbe   :  { %v401_v58 = vmax.f32 %v257_v55, 0.0  ;;  %v279_v59 = vpop.f32.mrf.mxu2  ;;  %766 = vmatpush.msra.mxu3 %v739_v29  ;;  %786 = vmatpush.msra.mxu1 %v758_v34  ;;  %v745_v55 = vld [vmem:[#allocation8 + $0x90] sm:$0xff] }
  0xbf   :  { %v280_v60 = vadd.f32 %v279_v59, %v199_v35  ;;  %v734_v35 = vld [vmem:[#allocation8 + $0x38] sm:$0xff]  ;;  %v743_v59 = vld [vmem:[#allocation8 + $0x80] sm:$0xff] }
  0xc0   :  { %558 = vmatmul.f32.gmra.mxu3 %v401_v58  ;;  %787 = vmatpush.msra.mxu1 %v757_v37 }
  0xc1   :  { %v303_v63 = vadd.f32 %v302_v56, %v280_v60  ;;  %767 = vmatpush.msra.mxu3 %v738_v30 }
  0xc3   :  { %v402_v2 = vmax.f32 %v303_v63, 0.0  ;;  %768 = vmatpush.msra.mxu3 %v737_v31 }
  0xc5   :  { %v322_v4 = vpop.f32.mrf.mxu1  ;;  %581 = vmatmul.f32.gmra.mxu1 %v402_v2  ;;  %769 = vmatpush.msra.mxu3 %v736_v32 }
  0xc6   :  { %v323_v6 = vadd.f32 %v322_v4, %v200_v1  ;;  %v825_v4 = vld [vmem:[%s1248_s7 + $0x70] sm:$0xff] }
  0xc7   :  { %v345_v7 = vpop.f32.mrf.mxu3  ;;  %770 = vmatpush.msra.mxu3 %v735_v33 }
  0xc8   :  { %v346_v8 = vadd.f32 %v345_v7, %v323_v6  ;;  %647 = vmatmul.f32.vlgmr.msrb.gmra.mxu3 %v397_v39  ;;  %v756_v39 = vld [vmem:[#allocation8 + $0xe8] sm:$0xff] }
  0xc9   :  { %771 = vmatpush.msra.mxu3 %v734_v35  ;;  %788 = vmatpush.msra.mxu1 %v756_v39  ;;  %v824_v6 = vld [vmem:[%s1248_s7 + $0x68] sm:$0xff] }
  0xca   :  { %v399_v9 = vmax.f32 %v346_v8, 0.0 }
  0xcb   :  { %772 = vmatpush.msra.mxu3 %v733_v36  ;;  %789 = vmatpush.msra.mxu1 %v755_v41  ;;  %v818_v41 = vld [vmem:[%s1248_s7 + $0x38] sm:$0xff] }
  0xcc   :  { %601 = vmatmul.f32.vlgmr.msra.gmra.mxu2 %v399_v9 }
  0xcd   :  { %v325_v10 = vpop.f32.mrf.mxu1  ;;  %670 = vmatmul.f32.vlgmr.msrb.gmra.mxu1 %v398_v51  ;;  %773 = vmatpush.msra.mxu3 %v732_v38  ;;  %v749_v51 = vld [vmem:[#allocation8 + $0xb0] sm:$0xff] }
  0xce   :  { %v326_v11 = vadd.f32 %v325_v10, %v200_v1  ;;  %790 = vmatpush.msra.mxu1 %v754_v43  ;;  %831 = vmatpush.msra.mxu2 %v826_v3  ;;  %v816_v43 = vld [vmem:[%s1248_s7 + $0x28] sm:$0xff] }
  0xcf   :  { %v348_v12 = vpop.f32.mrf.mxu3  ;;  %774 = vmatpush.msra.mxu3 %v731_v40 }
  0xd0   :  { %v349_v15 = vadd.f32 %v348_v12, %v326_v11  ;;  %650 = vmatmul.f32.gmra.mxu3 %v401_v58  ;;  %791 = vmatpush.msra.mxu1 %v753_v45  ;;  %v533_v58 = vld [vmem:[%s1245_s4] sm:$0x3]  ;;  %v814_v45 = vld [vmem:[%s1248_s7 + $0x18] sm:$0xff] }
  0xd1   :  { %v391_v16 = vpop.f32.mrf.mxu2  ;;  %775 = vmatpush.msra.mxu3 %v730_v42  ;;  %v535_v60 = vperm.slane %v533_v58, 0  ;;  %832 = vmatpush.msra.mxu2 %v825_v4  ;;  %v823_v11 = vld [vmem:[%s1248_s7 + $0x60] sm:$0xff]  ;;  %v536_v18 = vperm.slane %v533_v58, 1  ;;  %v817_v42 = vld [vmem:[%s1248_s7 + $0x30] sm:$0xff] }
  0xd2   :  { %v403_v19 = vmax.f32 %v349_v15, 0.0  ;;  %v368_v20 = vpop.f32.mrf.mxu0  ;;  %792 = vmatpush.msra.mxu1 %v752_v47  ;;  %v812_v47 = vld [vmem:[%s1248_s7 + $0x8] sm:$0xff] }
  0xd3   :  { %v369_v21 = vadd.f32 %v368_v20, %v201_v13  ;;  %776 = vmatpush.msra.mxu3 %v729_v44  ;;  %833 = vmatpush.msra.mxu2 %v824_v6  ;;  %v815_v44 = vld [vmem:[%s1248_s7 + $0x20] sm:$0xff] }
  0xd4   :  { %604 = vmatmul.f32.gmra.mxu2 %v403_v19  ;;  %793 = vmatpush.msra.mxu1 %v751_v49  ;;  %v856_v6 = vld [vmem:[%s1250_s9] sm:$0xff] }
  0xd5   :  { %v392_v22 = vadd.f32 %v391_v16, %v369_v21  ;;  %673 = vmatmul.f32.gmra.mxu1 %v402_v2  ;;  %777 = vmatpush.msra.mxu3 %v728_v46  ;;  %v820_v21 = vld [vmem:[%s1248_s7 + $0x48] sm:$0xff]  ;;  %v813_v46 = vld [vmem:[%s1248_s7 + $0x10] sm:$0xff] }
  0xd6   :  { %794 = vmatpush.msra.mxu1 %v750_v50  ;;  %834 = vmatpush.msra.mxu2 %v823_v11  ;;  %v938_v50 = vld [vmem:[%s1247_s6] ss:$0 sm:$0xff] }
  0xd7   :  { %v400_v14 = vmax.f32 %v392_v22, 0.0  ;;  %778 = vmatpush.msra.mxu3 %v727_v48  ;;  %v811_v48 = vld [vmem:[%s1248_s7] sm:$0xff] }
  0xd8   :  { %795 = vmatpush.msra.mxu1 %v749_v51 }
  0xd9   :  { %624 = vmatmul.f32.vlgmr.msra.gmra.mxu0 %v400_v14  ;;  %v394_v24 = vpop.f32.mrf.mxu2 }
  0xda   :  { %v371_v23 = vpop.f32.mrf.mxu0  ;;  %796 = vmatpush.msra.mxu1 %v748_v52 }
  0xdb   :  { %v372_v25 = vadd.f32 %v371_v23, %v201_v13  ;;  %v822_v13 = vld [vmem:[%s1248_s7 + $0x58] sm:$0xff] }
  0xdc   :  { %693 = vmatmul.f32.vlgmr.msrb.gmra.mxu2 %v399_v9  ;;  %797 = vmatpush.msra.mxu1 %v747_v53 }
  0xdd   :  { %v395_v26 = vadd.f32 %v394_v24, %v372_v25  ;;  %835 = vmatpush.msra.mxu2 %v822_v13  ;;  %v819_v24 = vld [vmem:[%s1248_s7 + $0x40] sm:$0xff] }
  0xde   :  { %798 = vmatpush.msra.mxu1 %v746_v54 }
  0xdf   :  { %v404_v27 = vmax.f32 %v395_v26, 0.0 }
  0xe0   :  { %799 = vmatpush.msra.mxu1 %v745_v55 }
  0xe1   :  { %627 = vmatmul.f32.gmra.mxu0 %v404_v27 }
  0xe2   :  { %800 = vmatpush.msra.mxu1 %v744_v57 }
  0xe4   :  { %696 = vmatmul.f32.gmra.mxu2 %v403_v19  ;;  %801 = vmatpush.msra.mxu1 %v743_v59  ;;  %v821_v19 = vld [vmem:[%s1248_s7 + $0x50] sm:$0xff] }
  0xe5   :  { %836 = vmatpush.msra.mxu2 %v821_v19 }
  0xe7   :  { %837 = vmatpush.msra.mxu2 %v820_v21 }
  0xe9   :  { %716 = vmatmul.f32.vlgmr.msrb.gmra.mxu0 %v400_v14  ;;  %838 = vmatpush.msra.mxu2 %v819_v24 }
  0xeb   :  { %839 = vmatpush.msra.mxu2 %v818_v41 }
  0xed   :  { %840 = vmatpush.msra.mxu2 %v817_v42 }
  0xef   :  { %841 = vmatpush.msra.mxu2 %v816_v43 }
  0xf1   :  { %719 = vmatmul.f32.gmra.mxu0 %v404_v27  ;;  %842 = vmatpush.msra.mxu2 %v815_v44 }
  0xf3   :  { %843 = vmatpush.msra.mxu2 %v814_v45 }
  0xf5   :  { %844 = vmatpush.msra.mxu2 %v813_v46 }
  0xf7   :  { %845 = vmatpush.msra.mxu2 %v812_v47 }
  0xf9   :  { %846 = vmatpush.msra.mxu2 %v811_v48 }
 0x13a   :  { %v556_v56 = vpop.f32.mrf.mxu3  ;;  %v579_v61 = vpop.f32.mrf.mxu1 }
 0x13b   :  { %v557_v63 = vadd.f32 %v556_v56, %v535_v60 }
 0x13d   :  { %v580_v2 = vadd.f32 %v579_v61, %v557_v63  ;;  %v1051_v61 = vmov 0  }
 0x13e   :  { %937 = vset.pattern.permute.xlu0 %v1051_v61 }
 0x142   :  { %v582_v7 = vpop.f32.mrf.mxu1 }
 0x143   :  { %v559_v1 = vpop.f32.mrf.mxu3 }
 0x144   :  { %v560_v8 = vadd.f32 %v559_v1, %v535_v60  ;;  %v887_v60 = vld [vmem:[#allocation2] sm:$0x1] }
 0x145   :  { %890 = vperm.xlu0 %937, %v887_v60  }
 0x146   :  { %v583_v16 = vadd.f32 %v582_v7, %v560_v8 }
 0x14a   :  { %v671_v25 = vpop.f32.mrf.mxu1 }
 0x14b   :  { %v648_v15 = vpop.f32.mrf.mxu3 }
 0x14c   :  { %v649_v14 = vadd.f32 %v648_v15, %v536_v18 }
 0x14e   :  { %v672_v17 = vadd.f32 %v671_v25, %v649_v14 }
 0x14f   :  { %v602_v0 = vpop.f32.mrf.mxu2 }
 0x150   :  { %v603_v5 = vadd.f32 %v602_v0, %v580_v2  ;;  %v939_v0 = vld [vmem:[%s1249_s8] ss:$0 sm:$0xff]  ;;  %s904_s8 = sshll.u32 %s1252_s11, 4  ;;  %s905_s8 = int_to_ptr.hbm [resolvable:$true] %s904_s8 }
 0x152   :  { %v674_v34 = vpop.f32.mrf.mxu1 }
 0x153   :  { %v651_v28 = vpop.f32.mrf.mxu3 }
 0x154   :  { %v652_v31 = vadd.f32 %v651_v28, %v536_v18 }
 0x156   :  { %v625_v62 = vpop.f32.mrf.mxu0  ;;  %v675_v36 = vadd.f32 %v674_v34, %v652_v31 }
 0x157   :  { %v626_v9 = vadd.f32 %v625_v62, %v603_v5  ;;  %v605_v10 = vpop.f32.mrf.mxu2 }
 0x158   :  { %v606_v20 = vadd.f32 %v605_v10, %v583_v16 }
 0x159   :  { %v723_v12 = vmax.f32 %v626_v9, 0.0 }
 0x15b   :  { %779 = vmatmul.f32.vlgmr.msra.gmra.mxu3 %v723_v12 }
 0x15e   :  { %v628_v22 = vpop.f32.mrf.mxu0 }
 0x15f   :  { %v629_v23 = vadd.f32 %v628_v22, %v606_v20  ;;  %v694_v26 = vpop.f32.mrf.mxu2 }
 0x160   :  { %v695_v29 = vadd.f32 %v694_v26, %v672_v17 }
 0x161   :  { %v725_v27 = vmax.f32 %v629_v23, 0.0 }
 0x163   :  { %782 = vmatmul.f32.gmra.mxu3 %v725_v27 }
 0x166   :  { %v717_v30 = vpop.f32.mrf.mxu0 }
 0x167   :  { %v718_v32 = vadd.f32 %v717_v30, %v695_v29  ;;  %v697_v35 = vpop.f32.mrf.mxu2 }
 0x168   :  { %v698_v37 = vadd.f32 %v697_v35, %v675_v36 }
 0x169   :  { %v724_v33 = vmax.f32 %v718_v32, 0.0 }
 0x16b   :  { %802 = vmatmul.f32.vlgmr.msra.gmra.mxu1 %v724_v33 }
 0x16e   :  { %v720_v38 = vpop.f32.mrf.mxu0 }
 0x16f   :  { %v721_v39 = vadd.f32 %v720_v38, %v698_v37 }
 0x171   :  { %v726_v40 = vmax.f32 %v721_v39, 0.0 }
 0x173   :  { %805 = vmatmul.f32.gmra.mxu1 %v726_v40 }
 0x1b7   :  { %v891_v7 = vpop.permute.xlu0 %890 }
 0x1b8   :  { %v893_v62 = vperm.slane %v891_v7, 0 }
 0x1de   :  { %v780_v49 = vpop.f32.mrf.mxu3 }
 0x1df   :  { %v781_v51 = vadd.f32 %v938_v50, %v780_v49 }
 0x1e6   :  { %v783_v55 = vpop.f32.mrf.mxu3 }
 0x1e7   :  { %v784_v56 = vadd.f32 %v938_v50, %v783_v55 }
 0x1e8   :  { %v803_v52 = vpop.f32.mrf.mxu1 }
 0x1e9   :  { %v804_v53 = vadd.f32 %v803_v52, %v781_v51 }
 0x1eb   :  { %v809_v54 = vmax.f32 %v804_v53, 0.0 }
 0x1ed   :  { %847 = vmatmul.f32.vlgmr.msra.gmra.mxu2 %v809_v54 }
 0x1f0   :  { %v806_v57 = vpop.f32.mrf.mxu1 }
 0x1f1   :  { %v807_v58 = vadd.f32 %v806_v57, %v784_v56 }
 0x1f3   :  { %v810_v59 = vmax.f32 %v807_v58, 0.0 }
 0x1f5   :  { %850 = vmatmul.f32.gmra.mxu2 %v810_v59 }
 0x270   :  { %v848_v63 = vpop.f32.mrf.mxu2 }
 0x271   :  { %v849_v3 = vadd.f32 %v939_v0, %v848_v63 }
 0x273   :  { %v854_v5 = vmax.f32 %v849_v3, 0.0 }
 0x278   :  { %v851_v1 = vpop.f32.mrf.mxu2 }
 0x279   :  { %v852_v2 = vadd.f32 %v939_v0, %v851_v1 }
 0x27b   :  { %v855_v4 = vmax.f32 %v852_v2, 0.0 }
 0x27d   :  { %923 = vmatpush.xpose.msk.msra.mxu0 %vm857_vm1, %v855_v4 }
 0x281   :  { %924 = vmatpush.xpose.msk.msra.mxu0 %vm857_vm1, %v854_v5 }
 0x284   :  { %925 = vmatmul.msk.f32.vlgmr.msra.gmra.mxu0 %vm857_vm1, %v856_v6 }
 0x301   :  { %v884_v8 = vpop.f32.mrf.mxu0 }
 0x302   :  { %v894_v9 = vadd.f32 %v893_v62, %v884_v8 }
 0x304   :  { %896 = vst.msk [vmem:[#allocation9] sm:$0x1] %vm895_vm2, %v894_v9 }
 0x305   :  { %907 = dma.vmem_to_hbm [thread:$0]  %s903_s16, 16, %s905_s8, [#allocation5]  }
 0x306   :  { %1040 = dma.done.wait [#allocation5], 16  }
 0x307   :  { %1041 = vsyncadd [#allocation5], 4294967280 }
 0x308   :  { %912 = vsyncpa [#allocation4], 1 }
 0x309   :  { %913 = vsyncpa [#allocation7], 1 }
 0x30a   :  { %914 = vsyncpa [#allocation5], 1 }

</bundles_post_ra>
